<compile_context>
chip_gen: v7x
topology: tpu7x:2x2x1
jax: 0.10.0
libtpu: 0.0.40
codegen_flags: <defaults>
</compile_context>

<pallas_src>
import functools

import jax
import jax.numpy as jnp
import numpy as np
from jax.experimental import pallas as pl
from jax.experimental.pallas import tpu as pltpu


def _mha_kernel(q_ref, k_ref, v_ref,
                wq_ref, bq_ref, wk_ref, bk_ref, wv_ref, bv_ref,
                wfc_ref, bfc_ref, gamma_ref, beta_ref,
                out_ref, attn_ref,
                kh_cache, vh_cache,
                *, n_head, d_k, d_v, inv_temperature, eps, compute_dtype):
    # --- K/V head projections: computed once per batch element, cached in VMEM scratch. ---
    # Valid because the qi grid axis is "arbitrary" (sequential within a batch element), so
    # all q-tiles of batch b run after this refresh and before the next batch element.
    @pl.when(pl.program_id(1) == 0)
    def _():
        k = k_ref[0]                                                    # (len_k, d_model)
        v = v_ref[0]
        kh = jnp.dot(k, wk_ref[...], preferred_element_type=jnp.float32) + bk_ref[...]
        vh = jnp.dot(v, wv_ref[...], preferred_element_type=jnp.float32) + bv_ref[...]
        kh_cache[...] = kh.astype(compute_dtype)                        # (len_k, n_head*d_k)
        vh_cache[...] = vh.astype(compute_dtype)                        # (len_k, n_head*d_v)

    q_res = q_ref[0]                                                    # (tile_q, d_model) f32
    q = q_res.astype(compute_dtype)

    # Fused (all-heads) Q projection: single full-width MXU matmul; 1/sqrt(d_k) folded in.
    qh_all = ((jnp.dot(q, wq_ref[...], preferred_element_type=jnp.float32)
               + bq_ref[...]) * inv_temperature).astype(compute_dtype)  # (tile_q, n_head*d_k)

    contract_last = (((1,), (1,)), ((), ()))                            # Q @ K^T, no batch dims

    head_outs = []
    for h in range(n_head):                                             # static unroll; n_head small
        qh = qh_all[:, h * d_k:(h + 1) * d_k]                           # (tile_q, d_k)
        kh = kh_cache[:, h * d_k:(h + 1) * d_k]                         # (len_k, d_k)
        vh = vh_cache[:, h * d_v:(h + 1) * d_v]                         # (len_k, d_v)

        scores = jax.lax.dot_general(
            qh, kh, dimension_numbers=contract_last,
            preferred_element_type=jnp.float32)                         # (tile_q, len_k) f32

        # Softmax along the key axis (== nn.Softmax(dim=2)), in f32; EUP approx reciprocal.
        m = jnp.max(scores, axis=-1, keepdims=True)
        e = jnp.exp(scores - m)
        s = jnp.sum(e, axis=-1, keepdims=True)
        attn = e * pl.reciprocal(s, approx=True)                        # (tile_q, len_k)

        # Store this head's probabilities immediately (lane-dense: last dim == len_k);
        # nothing O(len_q*len_k)-sized stays live across the head loop.
        attn_ref[h, 0] = attn.astype(attn_ref.dtype)

        head_outs.append(jnp.dot(attn.astype(compute_dtype), vh,
                                 preferred_element_type=jnp.float32))   # (tile_q, d_v)

    # Fused output projection across heads (one full-depth MXU matmul), + fc bias + residual.
    concat = jnp.concatenate(head_outs, axis=-1).astype(compute_dtype)  # (tile_q, n_head*d_v)
    x = (jnp.dot(concat, wfc_ref[...], preferred_element_type=jnp.float32)
         + bfc_ref[...] + q_res)                                        # (tile_q, d_model) f32

    # LayerNorm over d_model (biased variance, eps=1e-5 like torch), all in f32.
    mean = jnp.mean(x, axis=-1, keepdims=True)
    var = jnp.mean((x - mean) ** 2, axis=-1, keepdims=True)
    x_hat = (x - mean) * jax.lax.rsqrt(var + eps)
    out_ref[0] = (x_hat * gamma_ref[...] + beta_ref[...]).astype(out_ref.dtype)

    # TODO(synk): attention mask (masked_fill with -1e10) not supported; mask=None path only.
    # TODO(synk): dropout on attention weights / fc output omitted (eval-mode identity).


def _choose_tile_q(len_q, target):
    """Largest q-tile <= target that divides len_q; prefer multiples of 16 (bf16 packing)."""
    if len_q <= target:
        return len_q
    for align in (16, 8):
        start = target - (target % align)
        for t in range(start, align - 1, -align):
            if t > 0 and len_q % t == 0:
                return t
    return len_q  # fallback: may blow the VMEM budget for awkward sequence lengths


def _vmem_limit_and_tile_q(tile_q_target):
    """Per-generation VMEM budget / q-tile target (v7x has 64 MiB VMEM, v5e/v6e 128 MiB)."""
    cap = None
    try:
        cap = int(getattr(pltpu.get_tpu_info(), "vmem_capacity_bytes", 0)) or None
    except Exception:
        cap = None
    if cap is None:
        return 48 * 1024 * 1024, min(tile_q_target, 128)     # unknown chip: conservative
    if cap <= 64 * 1024 * 1024:
        return 56 * 1024 * 1024, min(tile_q_target, 128)     # v7x-class
    return 100 * 1024 * 1024, tile_q_target                  # v5e / v6e


def multi_head_attention(q, k, v, params, *, n_head, d_k, d_v,
                         tile_q_target=256, compute_dtype=jnp.bfloat16,
                         attn_dtype=jnp.bfloat16):
    sz_b, len_q, d_model = q.shape
    _, len_k, _ = k.shape
    inv_temperature = float(1.0 / np.power(d_k, 0.5))
    eps = 1e-5

    (wq, bq, wk, bk, wv, bv, wfc, bfc, gamma, beta) = params

    # Cast big matmul operands once on the host; biases / LayerNorm params stay f32, and q
    # stays f32 because it feeds the residual + LayerNorm path.
    wq_c = wq.astype(compute_dtype)
    wk_c = wk.astype(compute_dtype)
    wv_c = wv.astype(compute_dtype)
    wfc_c = wfc.astype(compute_dtype)
    k_c = k.astype(compute_dtype)
    v_c = v.astype(compute_dtype)

    vmem_limit, tile_q_target = _vmem_limit_and_tile_q(tile_q_target)
    tile_q = _choose_tile_q(len_q, tile_q_target)
    n_q_tiles = len_q // tile_q

    kernel = functools.partial(
        _mha_kernel, n_head=n_head, d_k=d_k, d_v=d_v,
        inv_temperature=inv_temperature, eps=eps, compute_dtype=compute_dtype)

    def rep(arr):  # grid-invariant (weights/params): DMA'd once, block index never changes
        nd = arr.ndim
        return pl.BlockSpec(arr.shape, lambda b, qi: (0,) * nd)

    # Advisory cost hint (attn writeback dominates bytes at realistic sizes).
    flops = (2 * sz_b * len_q * d_model * n_head * d_k                    # Q projection
             + 2 * sz_b * len_k * d_model * n_head * (d_k + d_v)          # K/V projection (1x/batch)
             + 2 * sz_b * len_q * n_head * d_v * d_model                  # output projection
             + 2 * n_head * sz_b * len_q * len_k * (d_k + d_v))           # scores + PV
    bytes_accessed = (q.size * 4 + k_c.size * k_c.dtype.itemsize + v_c.size * v_c.dtype.itemsize
                      + sz_b * len_q * d_model * 4
                      + n_head * sz_b * len_q * len_k * jnp.dtype(attn_dtype).itemsize)
    cost = pl.CostEstimate(flops=flops,
                           transcendentals=n_head * sz_b * len_q * len_k,
                           bytes_accessed=bytes_accessed)

    out, attn = pl.pallas_call(
        kernel,
        out_shape=(
            jax.ShapeDtypeStruct((sz_b, len_q, d_model), jnp.float32),
            # (n_head, sz_b, len_q, len_k) so the PyTorch (n_head*sz_b, ...) layout is a free
            # reshape on the host (no O(L^2) transpose).  bf16 by default (writeback-bound).
            jax.ShapeDtypeStruct((n_head, sz_b, len_q, len_k), attn_dtype),
        ),
        grid_spec=pltpu.PrefetchScalarGridSpec(
            num_scalar_prefetch=0,
            grid=(sz_b, n_q_tiles),
            in_specs=[
                pl.BlockSpec((1, tile_q, d_model), lambda b, qi: (b, qi, 0)),
                pl.BlockSpec((1, len_k, d_model), lambda b, qi: (b, 0, 0)),
                pl.BlockSpec((1, len_k, d_model), lambda b, qi: (b, 0, 0)),
                rep(wq_c), rep(bq), rep(wk_c), rep(bk), rep(wv_c), rep(bv),
                rep(wfc_c), rep(bfc), rep(gamma), rep(beta),
            ],
            out_specs=[
                pl.BlockSpec((1, tile_q, d_model), lambda b, qi: (b, qi, 0)),
                pl.BlockSpec((n_head, 1, tile_q, len_k), lambda b, qi: (0, b, qi, 0)),
            ],
            scratch_shapes=[
                pltpu.VMEM((len_k, n_head * d_k), compute_dtype),   # cached K head projections
                pltpu.VMEM((len_k, n_head * d_v), compute_dtype),   # cached V head projections
            ],
        ),
        compiler_params=pltpu.CompilerParams(
            # qi must be "arbitrary": the K/V caches are refreshed at qi == 0 and reused by
            # the following q-tiles of the same batch element.
            dimension_semantics=("parallel", "arbitrary"),
            vmem_limit_bytes=vmem_limit,
        ),
        cost_estimate=cost,
    )(q, k_c, v_c, wq_c, bq, wk_c, bk, wv_c, bv, wfc_c, bfc, gamma, beta)

    # Match PyTorch attn layout: (n_head * sz_b, len_q, len_k), index = h * sz_b + b.
    attn = attn.reshape(n_head * sz_b, len_q, len_k)
    return out, attn


def init_params(key, n_head, d_model, d_k, d_v):
    """Fused-head weight layout: wq/wk/wv: (d_model, n_head*d_k|d_v), wfc: (n_head*d_v, d_model).

    Column/row order is head-major (head h occupies [h*d_k, (h+1)*d_k)), matching the PyTorch
    module's .view(sz_b, len, n_head, d_k) split and its head-concat before fc.  Distributions
    match the module's init (normal for w_qs/w_ks/w_vs, xavier_normal for fc, uniform
    +-1/sqrt(fan_in) for Linear biases, ones/zeros for LayerNorm)."""
    ks = jax.random.split(key, 8)
    std_qk = np.sqrt(2.0 / (d_model + d_k))
    std_v = np.sqrt(2.0 / (d_model + d_v))
    std_fc = np.sqrt(2.0 / (n_head * d_v + d_model))      # xavier_normal_

    wq = (jax.random.normal(ks[0], (d_model, n_head * d_k)) * std_qk).astype(jnp.float32)
    wk = (jax.random.normal(ks[1], (d_model, n_head * d_k)) * std_qk).astype(jnp.float32)
    wv = (jax.random.normal(ks[2], (d_model, n_head * d_v)) * std_v).astype(jnp.float32)
    wfc = (jax.random.normal(ks[3], (n_head * d_v, d_model)) * std_fc).astype(jnp.float32)

    bnd_in = 1.0 / np.sqrt(d_model)
    bnd_fc = 1.0 / np.sqrt(n_head * d_v)
    bq = jax.random.uniform(ks[4], (1, n_head * d_k), minval=-bnd_in, maxval=bnd_in).astype(jnp.float32)
    bk = jax.random.uniform(ks[5], (1, n_head * d_k), minval=-bnd_in, maxval=bnd_in).astype(jnp.float32)
    bv = jax.random.uniform(ks[6], (1, n_head * d_v), minval=-bnd_in, maxval=bnd_in).astype(jnp.float32)
    bfc = jax.random.uniform(ks[7], (1, d_model), minval=-bnd_fc, maxval=bnd_fc).astype(jnp.float32)

    gamma = jnp.ones((1, d_model), jnp.float32)
    beta = jnp.zeros((1, d_model), jnp.float32)
    return (wq, bq, wk, bk, wv, bv, wfc, bfc, gamma, beta)


if __name__ == "__main__":
    n_head, d_model, d_k, d_v = 2, 32, 16, 16
    sz_b, seq = 2, 8

    key = jax.random.PRNGKey(0)
    kq, kk, kv, kp = jax.random.split(key, 4)
    q = jax.random.normal(kq, (sz_b, seq, d_model), jnp.float32)
    k = jax.random.normal(kk, (sz_b, seq, d_model), jnp.float32)
    v = jax.random.normal(kv, (sz_b, seq, d_model), jnp.float32)

    params = init_params(kp, n_head, d_model, d_k, d_v)

    out, attn = multi_head_attention(q, k, v, params, n_head=n_head, d_k=d_k, d_v=d_v)
    jax.block_until_ready((out, attn))

    assert out.shape == (sz_b, seq, d_model)
    assert attn.shape == (n_head * sz_b, seq, seq)
    print("KERNEL_OK")
</pallas_src>

<mosaic_0001>
module attributes {stable_mosaic.version = 11 : i64} {
  func.func @_mha_kernel(%arg0: i32, %arg1: i32, %arg2: memref<1x8x32xf32, #tpu.memory_space<vmem>>, %arg3: memref<1x8x32xbf16, #tpu.memory_space<vmem>>, %arg4: memref<1x8x32xbf16, #tpu.memory_space<vmem>>, %arg5: memref<32x32xbf16, #tpu.memory_space<vmem>>, %arg6: memref<1x32xf32, #tpu.memory_space<vmem>>, %arg7: memref<32x32xbf16, #tpu.memory_space<vmem>>, %arg8: memref<1x32xf32, #tpu.memory_space<vmem>>, %arg9: memref<32x32xbf16, #tpu.memory_space<vmem>>, %arg10: memref<1x32xf32, #tpu.memory_space<vmem>>, %arg11: memref<32x32xbf16, #tpu.memory_space<vmem>>, %arg12: memref<1x32xf32, #tpu.memory_space<vmem>>, %arg13: memref<1x32xf32, #tpu.memory_space<vmem>>, %arg14: memref<1x32xf32, #tpu.memory_space<vmem>>, %arg15: memref<1x8x32xf32, #tpu.memory_space<vmem>>, %arg16: memref<2x1x8x8xbf16, #tpu.memory_space<vmem>>, %arg17: memref<8x32xbf16, #tpu.memory_space<vmem>>, %arg18: memref<8x32xbf16, #tpu.memory_space<vmem>>) attributes {dimension_semantics = [#tpu.dimension_semantics<parallel>, #tpu.dimension_semantics<arbitrary>], iteration_bounds = array<i64: 2, 1>, scalar_prefetch = 0 : i64, scratch_operands = 2 : i64, tpu.core_type = #tpu.core_type<tc>, window_params = [{transform_indices = @transform_0, window_bounds = array<i64: 1, 8, 32>}, {transform_indices = @transform_1, window_bounds = array<i64: 1, 8, 32>}, {transform_indices = @transform_2, window_bounds = array<i64: 1, 8, 32>}, {pipeline_mode = #tpu.pipeline_mode<synchronous>, transform_indices = @transform_3, window_bounds = array<i64: 32, 32>}, {pipeline_mode = #tpu.pipeline_mode<synchronous>, transform_indices = @transform_4, window_bounds = array<i64: 1, 32>}, {pipeline_mode = #tpu.pipeline_mode<synchronous>, transform_indices = @transform_5, window_bounds = array<i64: 32, 32>}, {pipeline_mode = #tpu.pipeline_mode<synchronous>, transform_indices = @transform_6, window_bounds = array<i64: 1, 32>}, {pipeline_mode = #tpu.pipeline_mode<synchronous>, transform_indices = @transform_7, window_bounds = array<i64: 32, 32>}, {pipeline_mode = #tpu.pipeline_mode<synchronous>, transform_indices = @transform_8, window_bounds = array<i64: 1, 32>}, {pipeline_mode = #tpu.pipeline_mode<synchronous>, transform_indices = @transform_9, window_bounds = array<i64: 32, 32>}, {pipeline_mode = #tpu.pipeline_mode<synchronous>, transform_indices = @transform_10, window_bounds = array<i64: 1, 32>}, {pipeline_mode = #tpu.pipeline_mode<synchronous>, transform_indices = @transform_11, window_bounds = array<i64: 1, 32>}, {pipeline_mode = #tpu.pipeline_mode<synchronous>, transform_indices = @transform_12, window_bounds = array<i64: 1, 32>}, {transform_indices = @transform_13, window_bounds = array<i64: 1, 8, 32>}, {transform_indices = @transform_14, window_bounds = array<i64: 2, 1, 8, 8>}]} {
    %c0_i32 = arith.constant 0 : i32
    %0 = arith.cmpi eq, %arg1, %c0_i32 : i32
    %1 = arith.extui %0 : i1 to i32
    %c0_i32_0 = arith.constant 0 : i32
    %2 = arith.cmpi ne, %1, %c0_i32_0 : i32
    scf.if %2 {
      %c0_47 = arith.constant 0 : index
      %c0_48 = arith.constant 0 : index
      %c0_49 = arith.constant 0 : index
      %89 = vector.load %arg3[%c0_47, %c0_48, %c0_49] : memref<1x8x32xbf16, #tpu.memory_space<vmem>>, vector<1x8x32xbf16>
      %90 = vector.shape_cast %89 : vector<1x8x32xbf16> to vector<8x32xbf16>
      %c0_50 = arith.constant 0 : index
      %c0_51 = arith.constant 0 : index
      %c0_52 = arith.constant 0 : index
      %91 = vector.load %arg4[%c0_50, %c0_51, %c0_52] : memref<1x8x32xbf16, #tpu.memory_space<vmem>>, vector<1x8x32xbf16>
      %92 = vector.shape_cast %91 : vector<1x8x32xbf16> to vector<8x32xbf16>
      %c0_53 = arith.constant 0 : index
      %c0_54 = arith.constant 0 : index
      %93 = vector.load %arg7[%c0_53, %c0_54] : memref<32x32xbf16, #tpu.memory_space<vmem>>, vector<32x32xbf16>
      %cst_55 = arith.constant dense<0.000000e+00> : vector<8x32xf32>
      %94 = tpu.matmul %90, %93, %cst_55 {dimension_numbers = #tpu.dot_dimension_numbers<[1], [0], [0], [1], [0, 0, 1, 1], [], []>} : vector<8x32xbf16>, vector<32x32xbf16>, vector<8x32xf32> -> vector<8x32xf32>
      %c0_56 = arith.constant 0 : index
      %c0_57 = arith.constant 0 : index
      %95 = vector.load %arg8[%c0_56, %c0_57] : memref<1x32xf32, #tpu.memory_space<vmem>>, vector<1x32xf32>
      %96 = vector.broadcast %95 : vector<1x32xf32> to vector<8x32xf32>
      %97 = arith.addf %94, %96 : vector<8x32xf32>
      %c0_58 = arith.constant 0 : index
      %c0_59 = arith.constant 0 : index
      %98 = vector.load %arg9[%c0_58, %c0_59] : memref<32x32xbf16, #tpu.memory_space<vmem>>, vector<32x32xbf16>
      %cst_60 = arith.constant dense<0.000000e+00> : vector<8x32xf32>
      %99 = tpu.matmul %92, %98, %cst_60 {dimension_numbers = #tpu.dot_dimension_numbers<[1], [0], [0], [1], [0, 0, 1, 1], [], []>} : vector<8x32xbf16>, vector<32x32xbf16>, vector<8x32xf32> -> vector<8x32xf32>
      %c0_61 = arith.constant 0 : index
      %c0_62 = arith.constant 0 : index
      %100 = vector.load %arg10[%c0_61, %c0_62] : memref<1x32xf32, #tpu.memory_space<vmem>>, vector<1x32xf32>
      %101 = vector.broadcast %100 : vector<1x32xf32> to vector<8x32xf32>
      %102 = arith.addf %99, %101 : vector<8x32xf32>
      %103 = arith.truncf %97 : vector<8x32xf32> to vector<8x32xbf16>
      %c0_63 = arith.constant 0 : index
      %c0_64 = arith.constant 0 : index
      %104 = vector.load %arg17[%c0_63, %c0_64] : memref<8x32xbf16, #tpu.memory_space<vmem>>, vector<8x32xbf16>
      tpu.vector_store %arg17[%c0_63, %c0_64], %103 {strides = array<i32>} : memref<8x32xbf16, #tpu.memory_space<vmem>>, vector<8x32xbf16>,
      %105 = arith.truncf %102 : vector<8x32xf32> to vector<8x32xbf16>
      %c0_65 = arith.constant 0 : index
      %c0_66 = arith.constant 0 : index
      %106 = vector.load %arg18[%c0_65, %c0_66] : memref<8x32xbf16, #tpu.memory_space<vmem>>, vector<8x32xbf16>
      tpu.vector_store %arg18[%c0_65, %c0_66], %105 {strides = array<i32>} : memref<8x32xbf16, #tpu.memory_space<vmem>>, vector<8x32xbf16>,
    } else {
    }
    %c0 = arith.constant 0 : index
    %c0_1 = arith.constant 0 : index
    %c0_2 = arith.constant 0 : index
    %3 = vector.load %arg2[%c0, %c0_1, %c0_2] : memref<1x8x32xf32, #tpu.memory_space<vmem>>, vector<1x8x32xf32>
    %4 = vector.shape_cast %3 : vector<1x8x32xf32> to vector<8x32xf32>
    %5 = arith.truncf %4 : vector<8x32xf32> to vector<8x32xbf16>
    %c0_3 = arith.constant 0 : index
    %c0_4 = arith.constant 0 : index
    %6 = vector.load %arg5[%c0_3, %c0_4] : memref<32x32xbf16, #tpu.memory_space<vmem>>, vector<32x32xbf16>
    %cst = arith.constant dense<0.000000e+00> : vector<8x32xf32>
    %7 = tpu.matmul %5, %6, %cst {dimension_numbers = #tpu.dot_dimension_numbers<[1], [0], [0], [1], [0, 0, 1, 1], [], []>} : vector<8x32xbf16>, vector<32x32xbf16>, vector<8x32xf32> -> vector<8x32xf32>
    %c0_5 = arith.constant 0 : index
    %c0_6 = arith.constant 0 : index
    %8 = vector.load %arg6[%c0_5, %c0_6] : memref<1x32xf32, #tpu.memory_space<vmem>>, vector<1x32xf32>
    %9 = vector.broadcast %8 : vector<1x32xf32> to vector<8x32xf32>
    %10 = arith.addf %7, %9 : vector<8x32xf32>
    %cst_7 = arith.constant 2.500000e-01 : f32
    %11 = vector.broadcast %cst_7 : f32 to vector<8x32xf32>
    %12 = arith.mulf %10, %11 : vector<8x32xf32>
    %13 = arith.truncf %12 : vector<8x32xf32> to vector<8x32xbf16>
    %14 = vector.extract_strided_slice %13 {offsets = [0, 0], sizes = [8, 16], strides = [1, 1]} : vector<8x32xbf16> to vector<8x16xbf16>
    %c0_8 = arith.constant 0 : index
    %c0_9 = arith.constant 0 : index
    %15 = vector.load %arg17[%c0_8, %c0_9] : memref<8x32xbf16, #tpu.memory_space<vmem>>, vector<8x16xbf16>
    %c0_10 = arith.constant 0 : index
    %c0_11 = arith.constant 0 : index
    %16 = vector.load %arg18[%c0_10, %c0_11] : memref<8x32xbf16, #tpu.memory_space<vmem>>, vector<8x16xbf16>
    %cst_12 = arith.constant dense<0.000000e+00> : vector<8x8xf32>
    %17 = tpu.matmul %14, %15, %cst_12 {dimension_numbers = #tpu.dot_dimension_numbers<[1], [1], [0], [0], [0, 0, 1, 0], [], []>} : vector<8x16xbf16>, vector<8x16xbf16>, vector<8x8xf32> -> vector<8x8xf32>
    %cst_13 = arith.constant dense<0xFF800000> : vector<8xf32>
    %18 = vector.multi_reduction <maximumf>, %17, %cst_13 [1] : vector<8x8xf32> to vector<8xf32>
    %19 = vector.shape_cast %18 : vector<8xf32> to vector<8x1xf32>
    %20 = vector.broadcast %19 : vector<8x1xf32> to vector<8x8xf32>
    %21 = arith.subf %17, %20 : vector<8x8xf32>
    %22 = math.exp %21 : vector<8x8xf32>
    %cst_14 = arith.constant dense<0.000000e+00> : vector<8xf32>
    %23 = vector.multi_reduction <add>, %22, %cst_14 [1] : vector<8x8xf32> to vector<8xf32>
    %24 = vector.shape_cast %23 : vector<8xf32> to vector<8x1xf32>
    %25 = tpu.reciprocal %24 {approx = true} : vector<8x1xf32> -> vector<8x1xf32>
    %26 = vector.broadcast %25 : vector<8x1xf32> to vector<8x8xf32>
    %27 = arith.mulf %22, %26 : vector<8x8xf32>
    %28 = arith.truncf %27 : vector<8x8xf32> to vector<8x8xbf16>
    %c0_15 = arith.constant 0 : index
    %c0_16 = arith.constant 0 : index
    %c0_17 = arith.constant 0 : index
    %c0_18 = arith.constant 0 : index
    %29 = vector.load %arg16[%c0_15, %c0_16, %c0_17, %c0_18] : memref<2x1x8x8xbf16, #tpu.memory_space<vmem>>, vector<1x1x8x8xbf16>
    %30 = vector.shape_cast %29 : vector<1x1x8x8xbf16> to vector<8x8xbf16>
    %31 = vector.shape_cast %28 : vector<8x8xbf16> to vector<1x1x8x8xbf16>
    tpu.vector_store %arg16[%c0_15, %c0_16, %c0_17, %c0_18], %31 {strides = array<i32>} : memref<2x1x8x8xbf16, #tpu.memory_space<vmem>>, vector<1x1x8x8xbf16>,
    %32 = arith.truncf %27 : vector<8x8xf32> to vector<8x8xbf16>
    %cst_19 = arith.constant dense<0.000000e+00> : vector<8x16xf32>
    %33 = tpu.matmul %32, %16, %cst_19 {dimension_numbers = #tpu.dot_dimension_numbers<[1], [0], [0], [1], [0, 0, 1, 1], [], []>} : vector<8x8xbf16>, vector<8x16xbf16>, vector<8x16xf32> -> vector<8x16xf32>
    %34 = vector.extract_strided_slice %13 {offsets = [0, 16], sizes = [8, 16], strides = [1, 1]} : vector<8x32xbf16> to vector<8x16xbf16>
    %c0_20 = arith.constant 0 : index
    %c16 = arith.constant 16 : index
    %35 = vector.load %arg17[%c0_20, %c16] : memref<8x32xbf16, #tpu.memory_space<vmem>>, vector<8x16xbf16>
    %c0_21 = arith.constant 0 : index
    %c16_22 = arith.constant 16 : index
    %36 = vector.load %arg18[%c0_21, %c16_22] : memref<8x32xbf16, #tpu.memory_space<vmem>>, vector<8x16xbf16>
    %cst_23 = arith.constant dense<0.000000e+00> : vector<8x8xf32>
    %37 = tpu.matmul %34, %35, %cst_23 {dimension_numbers = #tpu.dot_dimension_numbers<[1], [1], [0], [0], [0, 0, 1, 0], [], []>} : vector<8x16xbf16>, vector<8x16xbf16>, vector<8x8xf32> -> vector<8x8xf32>
    %cst_24 = arith.constant dense<0xFF800000> : vector<8xf32>
    %38 = vector.multi_reduction <maximumf>, %37, %cst_24 [1] : vector<8x8xf32> to vector<8xf32>
    %39 = vector.shape_cast %38 : vector<8xf32> to vector<8x1xf32>
    %40 = vector.broadcast %39 : vector<8x1xf32> to vector<8x8xf32>
    %41 = arith.subf %37, %40 : vector<8x8xf32>
    %42 = math.exp %41 : vector<8x8xf32>
    %cst_25 = arith.constant dense<0.000000e+00> : vector<8xf32>
    %43 = vector.multi_reduction <add>, %42, %cst_25 [1] : vector<8x8xf32> to vector<8xf32>
    %44 = vector.shape_cast %43 : vector<8xf32> to vector<8x1xf32>
    %45 = tpu.reciprocal %44 {approx = true} : vector<8x1xf32> -> vector<8x1xf32>
    %46 = vector.broadcast %45 : vector<8x1xf32> to vector<8x8xf32>
    %47 = arith.mulf %42, %46 : vector<8x8xf32>
    %48 = arith.truncf %47 : vector<8x8xf32> to vector<8x8xbf16>
    %c1 = arith.constant 1 : index
    %c0_26 = arith.constant 0 : index
    %c0_27 = arith.constant 0 : index
    %c0_28 = arith.constant 0 : index
    %49 = vector.load %arg16[%c1, %c0_26, %c0_27, %c0_28] : memref<2x1x8x8xbf16, #tpu.memory_space<vmem>>, vector<1x1x8x8xbf16>
    %50 = vector.shape_cast %49 : vector<1x1x8x8xbf16> to vector<8x8xbf16>
    %51 = vector.shape_cast %48 : vector<8x8xbf16> to vector<1x1x8x8xbf16>
    tpu.vector_store %arg16[%c1, %c0_26, %c0_27, %c0_28], %51 {strides = array<i32>} : memref<2x1x8x8xbf16, #tpu.memory_space<vmem>>, vector<1x1x8x8xbf16>,
    %52 = arith.truncf %47 : vector<8x8xf32> to vector<8x8xbf16>
    %cst_29 = arith.constant dense<0.000000e+00> : vector<8x16xf32>
    %53 = tpu.matmul %52, %36, %cst_29 {dimension_numbers = #tpu.dot_dimension_numbers<[1], [0], [0], [1], [0, 0, 1, 1], [], []>} : vector<8x8xbf16>, vector<8x16xbf16>, vector<8x16xf32> -> vector<8x16xf32>
    %54 = tpu.concatenate %33, %53 in 1 : vector<8x16xf32>, vector<8x16xf32> -> vector<8x32xf32>
    %55 = arith.truncf %54 : vector<8x32xf32> to vector<8x32xbf16>
    %c0_30 = arith.constant 0 : index
    %c0_31 = arith.constant 0 : index
    %56 = vector.load %arg11[%c0_30, %c0_31] : memref<32x32xbf16, #tpu.memory_space<vmem>>, vector<32x32xbf16>
    %cst_32 = arith.constant dense<0.000000e+00> : vector<8x32xf32>
    %57 = tpu.matmul %55, %56, %cst_32 {dimension_numbers = #tpu.dot_dimension_numbers<[1], [0], [0], [1], [0, 0, 1, 1], [], []>} : vector<8x32xbf16>, vector<32x32xbf16>, vector<8x32xf32> -> vector<8x32xf32>
    %c0_33 = arith.constant 0 : index
    %c0_34 = arith.constant 0 : index
    %58 = vector.load %arg12[%c0_33, %c0_34] : memref<1x32xf32, #tpu.memory_space<vmem>>, vector<1x32xf32>
    %59 = vector.broadcast %58 : vector<1x32xf32> to vector<8x32xf32>
    %60 = arith.addf %57, %59 : vector<8x32xf32>
    %61 = arith.addf %60, %4 : vector<8x32xf32>
    %cst_35 = arith.constant dense<0.000000e+00> : vector<8xf32>
    %62 = vector.multi_reduction <add>, %61, %cst_35 [1] : vector<8x32xf32> to vector<8xf32>
    %63 = vector.shape_cast %62 : vector<8xf32> to vector<8x1xf32>
    %cst_36 = arith.constant 3.200000e+01 : f32
    %64 = vector.broadcast %cst_36 : f32 to vector<8x1xf32>
    %65 = arith.divf %63, %64 : vector<8x1xf32>
    %66 = vector.broadcast %65 : vector<8x1xf32> to vector<8x32xf32>
    %67 = arith.subf %61, %66 : vector<8x32xf32>
    %68 = arith.mulf %67, %67 : vector<8x32xf32>
    %cst_37 = arith.constant dense<0.000000e+00> : vector<8xf32>
    %69 = vector.multi_reduction <add>, %68, %cst_37 [1] : vector<8x32xf32> to vector<8xf32>
    %70 = vector.shape_cast %69 : vector<8xf32> to vector<8x1xf32>
    %cst_38 = arith.constant 3.200000e+01 : f32
    %71 = vector.broadcast %cst_38 : f32 to vector<8x1xf32>
    %72 = arith.divf %70, %71 : vector<8x1xf32>
    %73 = vector.broadcast %65 : vector<8x1xf32> to vector<8x32xf32>
    %74 = arith.subf %61, %73 : vector<8x32xf32>
    %cst_39 = arith.constant 9.99999974E-6 : f32
    %75 = vector.broadcast %cst_39 : f32 to vector<8x1xf32>
    %76 = arith.addf %72, %75 : vector<8x1xf32>
    %77 = math.rsqrt %76 : vector<8x1xf32>
    %78 = vector.broadcast %77 : vector<8x1xf32> to vector<8x32xf32>
    %79 = arith.mulf %74, %78 : vector<8x32xf32>
    %c0_40 = arith.constant 0 : index
    %c0_41 = arith.constant 0 : index
    %80 = vector.load %arg13[%c0_40, %c0_41] : memref<1x32xf32, #tpu.memory_space<vmem>>, vector<1x32xf32>
    %81 = vector.broadcast %80 : vector<1x32xf32> to vector<8x32xf32>
    %82 = arith.mulf %79, %81 : vector<8x32xf32>
    %c0_42 = arith.constant 0 : index
    %c0_43 = arith.constant 0 : index
    %83 = vector.load %arg14[%c0_42, %c0_43] : memref<1x32xf32, #tpu.memory_space<vmem>>, vector<1x32xf32>
    %84 = vector.broadcast %83 : vector<1x32xf32> to vector<8x32xf32>
    %85 = arith.addf %82, %84 : vector<8x32xf32>
    %c0_44 = arith.constant 0 : index
    %c0_45 = arith.constant 0 : index
    %c0_46 = arith.constant 0 : index
    %86 = vector.load %arg15[%c0_44, %c0_45, %c0_46] : memref<1x8x32xf32, #tpu.memory_space<vmem>>, vector<1x8x32xf32>
    %87 = vector.shape_cast %86 : vector<1x8x32xf32> to vector<8x32xf32>
    %88 = vector.shape_cast %85 : vector<8x32xf32> to vector<1x8x32xf32>
    tpu.vector_store %arg15[%c0_44, %c0_45, %c0_46], %88 {strides = array<i32>} : memref<1x8x32xf32, #tpu.memory_space<vmem>>, vector<1x8x32xf32>,
    return
  }
  func.func @transform_0(%arg0: i32, %arg1: i32) -> (i32, i32, i32) {
    %c0_i32 = arith.constant 0 : i32
    %c0_i32_0 = arith.constant 0 : i32
    return %arg0, %arg1, %c0_i32 : i32, i32, i32
  }
  func.func @transform_1(%arg0: i32, %arg1: i32) -> (i32, i32, i32) {
    %c0_i32 = arith.constant 0 : i32
    %c0_i32_0 = arith.constant 0 : i32
    %c0_i32_1 = arith.constant 0 : i32
    return %arg0, %c0_i32, %c0_i32_0 : i32, i32, i32
  }
  func.func @transform_2(%arg0: i32, %arg1: i32) -> (i32, i32, i32) {
    %c0_i32 = arith.constant 0 : i32
    %c0_i32_0 = arith.constant 0 : i32
    %c0_i32_1 = arith.constant 0 : i32
    return %arg0, %c0_i32, %c0_i32_0 : i32, i32, i32
  }
  func.func @transform_3(%arg0: i32, %arg1: i32) -> (i32, i32) {
    %c0_i32 = arith.constant 0 : i32
    %c0_i32_0 = arith.constant 0 : i32
    %c0_i32_1 = arith.constant 0 : i32
    return %c0_i32, %c0_i32_0 : i32, i32
  }
  func.func @transform_4(%arg0: i32, %arg1: i32) -> (i32, i32) {
    %c0_i32 = arith.constant 0 : i32
    %c0_i32_0 = arith.constant 0 : i32
    %c0_i32_1 = arith.constant 0 : i32
    return %c0_i32, %c0_i32_0 : i32, i32
  }
  func.func @transform_5(%arg0: i32, %arg1: i32) -> (i32, i32) {
    %c0_i32 = arith.constant 0 : i32
    %c0_i32_0 = arith.constant 0 : i32
    %c0_i32_1 = arith.constant 0 : i32
    return %c0_i32, %c0_i32_0 : i32, i32
  }
  func.func @transform_6(%arg0: i32, %arg1: i32) -> (i32, i32) {
    %c0_i32 = arith.constant 0 : i32
    %c0_i32_0 = arith.constant 0 : i32
    %c0_i32_1 = arith.constant 0 : i32
    return %c0_i32, %c0_i32_0 : i32, i32
  }
  func.func @transform_7(%arg0: i32, %arg1: i32) -> (i32, i32) {
    %c0_i32 = arith.constant 0 : i32
    %c0_i32_0 = arith.constant 0 : i32
    %c0_i32_1 = arith.constant 0 : i32
    return %c0_i32, %c0_i32_0 : i32, i32
  }
  func.func @transform_8(%arg0: i32, %arg1: i32) -> (i32, i32) {
    %c0_i32 = arith.constant 0 : i32
    %c0_i32_0 = arith.constant 0 : i32
    %c0_i32_1 = arith.constant 0 : i32
    return %c0_i32, %c0_i32_0 : i32, i32
  }
  func.func @transform_9(%arg0: i32, %arg1: i32) -> (i32, i32) {
    %c0_i32 = arith.constant 0 : i32
    %c0_i32_0 = arith.constant 0 : i32
    %c0_i32_1 = arith.constant 0 : i32
    return %c0_i32, %c0_i32_0 : i32, i32
  }
  func.func @transform_10(%arg0: i32, %arg1: i32) -> (i32, i32) {
    %c0_i32 = arith.constant 0 : i32
    %c0_i32_0 = arith.constant 0 : i32
    %c0_i32_1 = arith.constant 0 : i32
    return %c0_i32, %c0_i32_0 : i32, i32
  }
  func.func @transform_11(%arg0: i32, %arg1: i32) -> (i32, i32) {
    %c0_i32 = arith.constant 0 : i32
    %c0_i32_0 = arith.constant 0 : i32
    %c0_i32_1 = arith.constant 0 : i32
    return %c0_i32, %c0_i32_0 : i32, i32
  }
  func.func @transform_12(%arg0: i32, %arg1: i32) -> (i32, i32) {
    %c0_i32 = arith.constant 0 : i32
    %c0_i32_0 = arith.constant 0 : i32
    %c0_i32_1 = arith.constant 0 : i32
    return %c0_i32, %c0_i32_0 : i32, i32
  }
  func.func @transform_13(%arg0: i32, %arg1: i32) -> (i32, i32, i32) {
    %c0_i32 = arith.constant 0 : i32
    %c0_i32_0 = arith.constant 0 : i32
    return %arg0, %arg1, %c0_i32 : i32, i32, i32
  }
  func.func @transform_14(%arg0: i32, %arg1: i32) -> (i32, i32, i32, i32) {
    %c0_i32 = arith.constant 0 : i32
    %c0_i32_0 = arith.constant 0 : i32
    %c0_i32_1 = arith.constant 0 : i32
    return %c0_i32, %arg0, %arg1, %c0_i32_0 : i32, i32, i32, i32
  }
}

</mosaic_0001>

<bundles_post_ra>
// kernel: tpu_custom_call.1
= control target key start
LH: loop header
LB: loop body
LE: loop exit
PB: predicated region body
PF: predicated region fallthrough
CT: control target
= control target key end

     0   :  { %s2535_s0 = inlined_call_operand.hbm [shape: f32[2,8,32], index: 0, kind: input, shape index: {}]   ;;  %s2536_s1 = inlined_call_operand.hbm [shape: bf16[2,8,32], index: 1, kind: input, shape index: {}]   ;;  %s2537_s2 = inlined_call_operand.hbm [shape: bf16[2,8,32], index: 2, kind: input, shape index: {}]   ;;  %s2538_s3 = inlined_call_operand.hbm [shape: bf16[32,32], index: 3, kind: input, shape index: {}]   ;;  %s2539_s4 = inlined_call_operand.vmem [shape: f32[1,32], index: 4, kind: input, shape index: {}]   ;;  %s2540_s5 = inlined_call_operand.vmem [shape: bf16[32,32], index: 5, kind: input, shape index: {}]   ;;  %s2541_s6 = inlined_call_operand.vmem [shape: f32[1,32], index: 6, kind: input, shape index: {}]   ;;  %s2542_s7 = inlined_call_operand.hbm [shape: bf16[32,32], index: 7, kind: input, shape index: {}]   ;;  %s2543_s8 = inlined_call_operand.hbm [shape: f32[1,32], index: 8, kind: input, shape index: {}]   ;;  %s2544_s9 = inlined_call_operand.vmem [shape: bf16[32,32], index: 9, kind: input, shape index: {}]   ;;  %s2545_s10 = inlined_call_operand.vmem [shape: f32[1,32], index: 10, kind: input, shape index: {}]   ;;  %s2546_s11 = inlined_call_operand.vmem [shape: f32[1,32], index: 11, kind: input, shape index: {}]   ;;  %s2547_s12 = inlined_call_operand.vmem [shape: f32[1,32], index: 12, kind: input, shape index: {}]   ;;  %s2548_s13 = inlined_call_operand.hbm [shape: f32[2,8,32], index: 13, kind: output, shape index: {0}]   ;;  %s2549_s14 = inlined_call_operand.hbm [shape: bf16[2,2,8,8], index: 14, kind: output, shape index: {1}]  }
   0x1   :  { %2575 = sst [smem:[#allocation32_spill]] %s2536_s1 }
   0x2   :  { %2576 = sst [smem:[#allocation33_spill]] %s2538_s3 }
   0x3   :  { %2577 = sst [smem:[#allocation34_spill]] %s2539_s4 }
   0x4   :  { %2578 = sst [smem:[#allocation35_spill]] %s2544_s9 }
   0x5   :  { %2579 = sst [smem:[#allocation36_spill]] %s2545_s10 }
   0x6   :  { %2580 = sst [smem:[#allocation37_spill]] %s2546_s11 }
   0x7   :  { %2581 = sst [smem:[#allocation38_spill]] %s2547_s12 }
   0x8   :  { %2582 = sst [smem:[#allocation39_spill]] %s2548_s13 }
   0x9   :  { %2583 = sst [smem:[#allocation40_spill]] %s2549_s14 }
   0xa   :  { %20 = vsyncpa [#allocation5], 0 }
   0xb   :  { %22 = vsyncpa [#allocation5 + $0x1], 0 }
   0xc   :  { %23 = vsyncpa [#allocation8], 0 }
   0xd   :  { %25 = vsyncpa [#allocation8 + $0x1], 0 }
   0xe   :  { %26 = vsyncpa [#allocation11], 0 }
   0xf   :  { %27 = vsyncpa [#allocation14], 0 }
  0x10   :  { %28 = vsyncpa [#allocation6], 0 }
  0x11   :  { %30 = vsyncpa [#allocation6 + $0x1], 0 }
  0x12   :  { %31 = vsyncpa [#allocation17], 0 }
  0x13   :  { %33 = vsyncpa [#allocation17 + $0x1], 0  ;;  %s2059_s29 = smov 0   ;;  %s2061_s30 = smov 0  }
  0x14   :  { %s2063_s15 = smov 0   ;;  %s2065_s16 = smov 0  }
  0x15   :  { %s2067_s17 = smov 0   ;;  %s2069_s18 = smov 0  }
  0x16 LB: > { %2584 = sst [smem:[#allocation24_spill]] %s1945_s29  ;;  %s2090_s19 = sadd.s32 4294967295, %s1965_s18   ;;  %s1965_s18 = sphi %s2069_s18, %s39_s18   ;;  %s1961_s17 = sphi %s2067_s17, %s2637_s17   ;;  %s1957_s16 = sphi %s2065_s16, %s2636_s16   ;;  %s1953_s15 = sphi %s2063_s15, %s2632_s15   ;;  %s1949_s30 = sphi %s2061_s30, %s2635_s30   ;;  %s1945_s29 = sphi %s2059_s29, %s2634_s29  }
  0x17   : > { %2585 = sst [smem:[#allocation25_spill]] %s1953_s15  ;;  %s1400_s20 = sadd.s32 4294967294, %s1965_s18  }
  0x18   : > { %2586 = sst [smem:[#allocation26_spill]] %s1957_s16  ;;  %p73_p0 = scmp.ne.s32.totalorder %s1949_s30, %s1945_s29 }
  0x19   : > { %2587 = sst [smem:[#allocation27_spill]] %s1965_s18  ;;  %p2553_p1 = scmp.eq.s32.totalorder %s2090_s19, 0 }
  0x1a   : > { %p367_p3 = scmp.eq.s32.totalorder %s1400_s20, 1  ;;  %p1401_p5 = scmp.ge.s32.totalorder %s1965_s18, 1 }
  0x1b   : > { %p2099_p4 = por %p2553_p1, %p73_p0  ;;  %p402_p7 = scmp.lt.s32.totalorder %s1965_s18, 3 }
  0x1c   : > { %p2104_p6 = por %p367_p3, %p73_p0  ;;  %s1967_s24 = smov [#allocation10]  }
  0x1d   : > { %s2588_s21 = scalar_select %p2099_p4, 1, 0 }
  0x1e   : > { %s2589_s22 = scalar_select %p2104_p6, 1, 0 }
  0x1f   : > { %p2109_p8 = pnand %p1401_p5, %p402_p7  ;;  %s414_s25 = sshll.u32 %s1967_s24, 4  ;;  %s415_s25 = int_to_ptr.vmem [resolvable:$true] %s414_s25 }
  0x20   : > { %2590 = sst [smem:[#allocation28_spill]] %s2589_s22  ;;  %s51_s27 = sadd.s32 1, %s1961_s17 }
  0x21   : > { %s2591_s23 = scalar_select %p2109_p8, 1, 0 }
  0x22   : > { %p1550_p9 = pneg %p2109_p8  ;;  %s2593_s3 = sld [smem:[#allocation33_spill]] }
  0x24   : > { %p2118_p11 = pnand %p1550_p9, %p2553_p1 }
  0x26   : > { %s2592_s26 = scalar_select %p2118_p11, 1, 0 }
  0x27   : > { %p2131_p13 = pneg %p2118_p11 }
  0x28   : > { %s1665_s22 = scalar_lea.hbm %s2593_s3, 256 }
  0x29   : > { %p1666_p12 = scmp.ne.s32.totalorder %s2593_s3, %s1665_s22  ;;  %p1672_p5 = scmp.lt.u32.totalorder %s1665_s22, %s2593_s3 }
  0x2a   : > { %s2594_s24 = scalar_select %p2131_p13, 1, 0 }
  0x2b   : > { %p1668_p0 = pnand %p2131_p13, %p1666_p12 }
  0x2d   : > { %p1669_p3 = pneg %p1668_p0 }
  0x2f   : > { %p1674_p7 = pnand %p1672_p5, %p1669_p3 }
  0x31   : > { %1677 = shalt.err (!%p1674_p7)
}
  0x32   : > { %s1678_s28 = scalar_lea.vmem %s415_s25, 256  ;;  %p1686_p2 = scmp.lt.s32.totalorder %s415_s25, %s415_s25 }
  0x33   : > { %p1679_p9 = scmp.ne.s32.totalorder %s415_s25, %s1678_s28  ;;  %p1687_p6 = scmp.lt.s32.totalorder %s1678_s28, %s1678_s28 }
  0x35   : > { %p1681_p10 = pnand %p1679_p9, %p2131_p13  ;;  %p1688_p4 = por %p1687_p6, %p1686_p2 }
  0x37   : > { %p1682_p1 = pneg %p1681_p10 }
  0x39   : > { %p1689_p8 = pnand %p1688_p4, %p1682_p1 }
  0x3b   : > { %1692 = shalt.err (!%p1689_p8)
}
  0x3c   : > { %s2557_s13 = smov 64   ;;  %s2558_s11 = smov 4  }
  0x3d   : > { %1553 = dma.hbm_to_vmem [thread:$0]  (!%p2118_p11), %s2593_s3, 256, %s415_s25, [#allocation11], %s2557_s13, %s2557_s13, %s2558_s11  }
  0x3e   : > { %p53_p1 = scmp.ge.s32.totalorder %s51_s27, 2  ;;  %s60_s22 = sadd.s32 1, %s1953_s15 }
  0x3f   : > { %p67_p2 = scmp.ne.s32.totalorder %s1953_s15, %s1949_s30  ;;  %p68_p4 = scmp.eq.s32.totalorder %s1965_s18, 0 }
  0x40   : > { %s2639_s27 = smov (%p53_p1, %s51_s27), 0  ;;  %p2596_p8 = scmp.eq.s32.totalorder %s2090_s19, 1 }
  0x41   : > { %2595 = sst [smem:[#allocation29_spill]] %s2639_s27  ;;  %p69_p6 = por %p68_p4, %p67_p2 }
  0x42   : > { %p2158_p10 = por %p2596_p8, %p67_p2  ;;  %s55_s28 = ssub.s32 %s1961_s17, %s2639_s27 }
  0x43   : > { %p1580_p12 = scmp.lt.s32.totalorder %s1965_s18, 2  ;;  %p58_p0 = scmp.eq.s32.totalorder %s55_s28, 0 }
  0x44   : > { %s2597_s20 = scalar_select %p2158_p10, 1, 0 }
  0x45   : > { %s2166_s14 = sand.u32 1, %s1953_s15   ;;  %p2168_p3 = pnand %p1580_p12, %p69_p6 }
  0x46   : > { %2598 = sst [smem:[#allocation30_spill]] %s2597_s20  ;;  %s492_s12 = sand.u32 1, %s1965_s18  }
  0x47   : > { %s2599_s25 = scalar_select %p2168_p3, 1, 0 }
  0x48   : > { %s2174_s29 = scalar_select %p58_p0, %s1953_s15, %s60_s22  }
  0x49   : > { %s2566_s13 = sshll.u32 %s2166_s14, 2  ;;  %s1409_s11 = sshll.u32 %s1961_s17, 6 }
  0x4a   : > { %2600 = sst [smem:[#allocation31_spill]] %s2174_s29  ;;  %s2601_s1 = sld [smem:[#allocation32_spill]] }
  0x4b   : > { %s496_s28 = scalar_lea.vmem [#allocation7], %s2566_s13  ;;  %s2190_s22 = scalar_lea.hbm %s2537_s2, %s1409_s11 }
  0x4c   : > { %s503_s20 = sshll.u32 %s496_s28, 4  ;;  %s2192_s29 = scalar_lea.sflag [#allocation8], %s492_s12  ;;  %s2185_s20 = int_to_ptr.vmem [resolvable:$true] %s503_s20 }
  0x4d   : > { %p2198_p7 = pneg %p2168_p3 }
  0x50   : > { %s2181_s27 = scalar_lea.hbm %s2601_s1, %s1409_s11  ;;  %s1698_s13 = scalar_lea.hbm %s2601_s1, 128 }
  0x51   : > { %s1693_s15 = scalar_lea.hbm %s2181_s27, 64  ;;  %p1699_p2 = scmp.lt.u32.totalorder %s2181_s27, %s2601_s1 }
  0x52   : > { %p1694_p5 = scmp.ne.s32.totalorder %s2181_s27, %s1693_s15  ;;  %p1700_p4 = scmp.lt.u32.totalorder %s1698_s13, %s1693_s15 }
  0x53   : > { %p1702_p8 = scmp.lt.u32.totalorder %s1693_s15, %s2181_s27 }
  0x54   : > { %p1696_p9 = pnand %p2198_p7, %p1694_p5  ;;  %p1701_p6 = por %p1700_p4, %p1699_p2 }
  0x56   : > { %p1697_p1 = pneg %p1696_p9  ;;  %p1703_p12 = por %p1702_p8, %p1701_p6 }
  0x58   : > { %p1704_p0 = pnand %p1703_p12, %p1697_p1 }
  0x5a   : > { %1707 = shalt.err (!%p1704_p0)
}
  0x5b   : > { %s1708_s11 = scalar_lea.vmem %s2185_s20, 64  ;;  %s1970_s12 = smov [#allocation7]  }
  0x5c   : > { %p1709_p5 = scmp.ne.s32.totalorder %s2185_s20, %s1708_s11  ;;  %s1713_s16 = sshll.u32 %s1970_s12, 4  ;;  %s1714_s16 = int_to_ptr.vmem [resolvable:$false] %s1713_s16 }
  0x5d   : > { %s1715_s28 = scalar_lea.vmem %s1714_s16, 128  ;;  %p1716_p11 = scmp.lt.s32.totalorder %s2185_s20, %s1714_s16 }
  0x5e   : > { %p1711_p9 = pnand %p1709_p5, %p2198_p7  ;;  %p1717_p13 = scmp.lt.s32.totalorder %s1715_s28, %s1708_s11 }
  0x60   : > { %p1712_p10 = pneg %p1711_p9  ;;  %p1718_p2 = por %p1717_p13, %p1716_p11 }
  0x62   : > { %p1719_p4 = pnand %p1718_p2, %p1712_p10 }
  0x64   : > { %1722 = shalt.err (!%p1719_p4)
}
  0x65   : > { %1566 = dma.hbm_to_vmem [thread:$0]  (!%p2168_p3), %s2181_s27, 64, %s2185_s20, %s2192_s29  }
  0x66   : > { %s1971_s15 = smov [#allocation12]   ;;  %s1972_s10 = smov [#allocation13]  }
  0x67   : > { %s436_s13 = sshll.u32 %s1971_s15, 4  ;;  %s450_s18 = sshll.u32 %s1972_s10, 4  ;;  %s437_s13 = int_to_ptr.vmem [resolvable:$true] %s436_s13  ;;  %s2222_s18 = int_to_ptr.vmem [resolvable:$true] %s450_s18 }
  0x68   : > { %s1723_s11 = scalar_lea.hbm %s2542_s7, 256  ;;  %p2603_p13 = scmp.ne.s32.totalorder %s2594_s24, 0 }
  0x69   : > { %p1724_p11 = scmp.ne.s32.totalorder %s2542_s7, %s1723_s11  ;;  %p1730_p6 = scmp.lt.u32.totalorder %s1723_s11, %s2542_s7 }
  0x6b   : > { %p1726_p10 = pnand %p1724_p11, %p2603_p13 }
  0x6d   : > { %p1727_p1 = pneg %p1726_p10 }
  0x6f   : > { %p1732_p8 = pnand %p1730_p6, %p1727_p1 }
  0x71   : > { %1735 = shalt.err (!%p1732_p8)
}
  0x72   : > { %s1736_s20 = scalar_lea.vmem %s437_s13, 256  ;;  %p1744_p9 = scmp.lt.s32.totalorder %s437_s13, %s437_s13 }
  0x73   : > { %p1737_p12 = scmp.ne.s32.totalorder %s437_s13, %s1736_s20  ;;  %p1745_p2 = scmp.lt.s32.totalorder %s1736_s20, %s1736_s20 }
  0x75   : > { %p1739_p0 = pnand %p1737_p12, %p2603_p13  ;;  %p1746_p4 = por %p1745_p2, %p1744_p9 }
  0x77   : > { %p1740_p5 = pneg %p1739_p0 }
  0x79   : > { %p1747_p3 = pnand %p1746_p4, %p1740_p5 }
  0x7b   : > { %1750 = shalt.err (!%p1747_p3)
}
  0x7c   : > { %p2604_p11 = scmp.ne.s32.totalorder %s2592_s26, 0  ;;  %s2605_s1 = smov 4  }
  0x7d   : > { %s2606_s15 = smov 64   ;;  %s1751_s11 = scalar_lea.hbm %s2543_s8, 16 }
  0x7e   : > { %1556 = dma.hbm_to_vmem [thread:$0]  (!%p2604_p11), %s2542_s7, 256, %s437_s13, [#allocation11], %s2606_s15, %s2606_s15, %s2605_s1  }
  0x7f   : > { %p1752_p10 = scmp.ne.s32.totalorder %s2543_s8, %s1751_s11  ;;  %p1758_p6 = scmp.lt.u32.totalorder %s1751_s11, %s2543_s8 }
  0x81   : > { %p1754_p3 = pnand %p1752_p10, %p2603_p13 }
  0x83   : > { %p1755_p1 = pneg %p1754_p3 }
  0x85   : > { %p1760_p8 = pnand %p1758_p6, %p1755_p1 }
  0x87   : > { %1763 = shalt.err (!%p1760_p8)
}
  0x88   : > { %s1764_s13 = scalar_lea.vmem %s2222_s18, 16  ;;  %s1771_s1 = scalar_lea.vmem %s2222_s18, 32 }
  0x89   : > { %p1765_p12 = scmp.ne.s32.totalorder %s2222_s18, %s1764_s13  ;;  %p1772_p9 = scmp.lt.s32.totalorder %s2222_s18, %s2222_s18 }
  0x8a   : > { %p1773_p2 = scmp.lt.s32.totalorder %s1771_s1, %s1764_s13 }
  0x8b   : > { %p1767_p0 = pnand %p1765_p12, %p2603_p13 }
  0x8c   : > { %p1774_p4 = por %p1773_p2, %p1772_p9 }
  0x8d   : > { %p1768_p5 = pneg %p1767_p0 }
  0x8f   : > { %p1775_p10 = pnand %p1774_p4, %p1768_p5 }
  0x91   : > { %1778 = shalt.err (!%p1775_p10)
}
  0x92   : > { %1559 = dma.hbm_to_vmem [thread:$0]  (!%p2604_p11), %s2543_s8, 16, %s2222_s18, [#allocation14]  }
  0x93   : > { %s1406_s24 = sshll.u32 %s2166_s14, 3  ;;  %s1407_s9 = sshll.u32 %s1961_s17, 7 }
  0x94   : > { %s2274_s16 = scalar_lea.hbm %s2535_s0, %s1407_s9  ;;  %s477_s26 = scalar_lea.vmem [#allocation4], %s1406_s24 }
  0x95   : > { %s485_s11 = sshll.u32 %s477_s26, 4  ;;  %s2607_s28 = sshll.u32 %s2166_s14, 2  ;;  %s2276_s11 = int_to_ptr.vmem [resolvable:$true] %s485_s11 }
  0x96   : > { %s2280_s27 = scalar_lea.vmem [#allocation9], %s2607_s28  ;;  %s474_s20 = scalar_lea.sflag [#allocation5], %s2166_s14 }
  0x97   : > { %s521_s18 = sshll.u32 %s2280_s27, 4  ;;  %s1779_s13 = scalar_lea.hbm %s2274_s16, 128  ;;  %s522_s18 = int_to_ptr.vmem [resolvable:$true] %s521_s18 }
  0x98   : > { %p1780_p13 = scmp.ne.s32.totalorder %s2274_s16, %s1779_s13  ;;  %s1784_s15 = scalar_lea.hbm %s2535_s0, 256 }
  0x99   : > { %p1785_p1 = scmp.lt.u32.totalorder %s2274_s16, %s2535_s0  ;;  %p1786_p6 = scmp.lt.u32.totalorder %s1784_s15, %s1779_s13 }
  0x9a   : > { %p1782_p11 = pnand %p1780_p13, %p2198_p7  ;;  %p1788_p12 = scmp.lt.u32.totalorder %s1779_s13, %s2274_s16 }
  0x9b   : > { %p1787_p8 = por %p1786_p6, %p1785_p1 }
  0x9c   : > { %p1783_p3 = pneg %p1782_p11 }
  0x9d   : > { %p1789_p0 = por %p1788_p12, %p1787_p8 }
  0x9f   : > { %p1790_p5 = pnand %p1789_p0, %p1783_p3 }
  0xa1   : > { %1793 = shalt.err (!%p1790_p5)
}
  0xa2   : > { %s1794_s14 = scalar_lea.vmem %s2276_s11, 128  ;;  %s1973_s10 = smov [#allocation4]  }
  0xa3   : > { %p1795_p9 = scmp.ne.s32.totalorder %s2276_s11, %s1794_s14  ;;  %s1799_s12 = sshll.u32 %s1973_s10, 4  ;;  %s1800_s12 = int_to_ptr.vmem [resolvable:$false] %s1799_s12 }
  0xa4   : > { %s1801_s26 = scalar_lea.vmem %s1800_s12, 256  ;;  %p1802_p10 = scmp.lt.s32.totalorder %s2276_s11, %s1800_s12 }
  0xa5   : > { %p1797_p2 = pnand %p1795_p9, %p2198_p7  ;;  %p1803_p13 = scmp.lt.s32.totalorder %s1801_s26, %s1794_s14 }
  0xa7   : > { %p1798_p4 = pneg %p1797_p2  ;;  %p1804_p11 = por %p1803_p13, %p1802_p10 }
  0xa9   : > { %p1805_p1 = pnand %p1804_p11, %p1798_p4 }
  0xab   : > { %1808 = shalt.err (!%p1805_p1)
}
  0xac   : > { %p2608_p3 = scmp.ne.s32.totalorder %s2599_s25, 0  ;;  %s1809_s28 = scalar_lea.hbm %s2190_s22, 64 }
  0xad   : > { %p1810_p6 = scmp.ne.s32.totalorder %s2190_s22, %s1809_s28  ;;  %s1814_s4 = scalar_lea.hbm %s2537_s2, 128 }
  0xae   : > { %1563 = dma.hbm_to_vmem [thread:$0]  (!%p2608_p3), %s2274_s16, 128, %s2276_s11, %s474_s20  }
  0xaf   : > { %p1812_p8 = pnand %p1810_p6, %p2198_p7  ;;  %p1815_p0 = scmp.lt.u32.totalorder %s2190_s22, %s2537_s2 }
  0xb0   : > { %p1816_p5 = scmp.lt.u32.totalorder %s1814_s4, %s1809_s28  ;;  %p1818_p2 = scmp.lt.u32.totalorder %s1809_s28, %s2190_s22 }
  0xb1   : > { %p1813_p12 = pneg %p1812_p8 }
  0xb2   : > { %p1817_p9 = por %p1816_p5, %p1815_p0 }
  0xb4   : > { %p1819_p4 = por %p1818_p2, %p1817_p9 }
  0xb6   : > { %p1820_p10 = pnand %p1819_p4, %p1813_p12 }
  0xb8   : > { %1823 = shalt.err (!%p1820_p10)
}
  0xb9   : > { %s1824_s16 = scalar_lea.vmem %s522_s18, 64  ;;  %s1974_s11 = smov [#allocation9]  }
  0xba   : > { %p1825_p13 = scmp.ne.s32.totalorder %s522_s18, %s1824_s16  ;;  %s1829_s27 = sshll.u32 %s1974_s11, 4  ;;  %s1830_s27 = int_to_ptr.vmem [resolvable:$false] %s1829_s27 }
  0xbb   : > { %s1831_s20 = scalar_lea.vmem %s1830_s27, 128  ;;  %p1832_p6 = scmp.lt.s32.totalorder %s522_s18, %s1830_s27 }
  0xbc   : > { %p1827_p11 = pnand %p1825_p13, %p2198_p7  ;;  %p1833_p8 = scmp.lt.s32.totalorder %s1831_s20, %s1824_s16 }
  0xbe   : > { %p1828_p1 = pneg %p1827_p11  ;;  %p1834_p3 = por %p1833_p8, %p1832_p6 }
  0xc0   : > { %p1835_p0 = pnand %p1834_p3, %p1828_p1 }
  0xc2   : > { %1838 = shalt.err (!%p1835_p0)
}
  0xc3   : > { %p2609_p5 = scmp.ne.s32.totalorder %s2599_s25, 0  ;;  %p2610_p12 = scmp.ne.s32.totalorder %s2591_s23, 0 }
  0xc4   : > { %s2328_s3 = sand.u32 (!%p2610_p12), 1, %s1949_s30   ;;  %p2611_p7 = scmp.ne.s32.totalorder (!%p2610_p12), %s2588_s21, 0 }
  0xc5   : > { %1569 = dma.hbm_to_vmem [thread:$0]  (!%p2609_p5), %s2190_s22, 64, %s522_s18, %s2192_s29  }
  0xc6   : > { %530 = sbr.rel (%p2610_p12) target bundleno = 1974 (0x7b6), region = 72  ;;  %s2331_s24 = sshll.u32 (!%p2610_p12), %s2328_s3, 3 }
  0xc7   : > { %s533_s14 = scalar_lea.sflag (!%p2610_p12), [#allocation5], %s2328_s3  ;;  %s536_s10 = scalar_lea.vmem (!%p2610_p12), [#allocation4], %s2331_s24 }
  0xcd   : > { %1920 = dma.done.wait (%p2611_p7), %s533_s14, 128  }
  0xce   : > { %1922 = vsyncadd (%p2611_p7), %s533_s14, 4294967168  ;;  %s541_s23 = sand.u32 1, %s2090_s19   ;;  %s1414_s25 = sshll.u32 %s2328_s3, 2 }
  0xcf   : > { %s542_s29 = scalar_lea.sflag [#allocation8], %s541_s23  ;;  %s545_s22 = scalar_lea.vmem [#allocation7], %s1414_s25 }
  0xd0   : > { %1924 = dma.done.wait (%p2611_p7), %s542_s29, 128  }
  0xd1   : > { %1926 = vsyncadd (%p2611_p7), %s542_s29, 4294967168  ;;  %s2345_s18 = scalar_lea.vmem [#allocation9], %s1414_s25  ;;  %p2612_p3 = scmp.eq.s32.totalorder %s2090_s19, 0 }
  0xd3   : > { %1928 = dma.done.wait (%p2612_p3), [#allocation11], 512   ;;  %p2613_p9 = pmov %p2612_p3 }
  0xd4   : > { %p2614_p2 = pmov %p2612_p3 }
  0xd5   : > { %1930 = vsyncadd (%p2613_p9), [#allocation11], 4294966784 }
  0xd6   : > { %1932 = dma.done.wait (%p2614_p2), [#allocation14], 16   ;;  %p2615_p4 = pmov %p2614_p2 }
  0xd7   : > { %v1975_v0 = vmov 0.0   ;;  %vm1976_vm0 = vmmov 0   ;;  %v1645_v1 = vld [vmem:[%s2540_s5] sm:$0xff]   ;;  %v1646_v2 = vld [vmem:[%s2540_s5 + $0x8] sm:$0xff]   ;;  %v631_v3 = vld [vmem:[%s545_s22] sm:$0xf] }
  0xd8   : > { %1934 = vsyncadd (%p2615_p4), [#allocation14], 4294967280  ;;  %1472 = vmatprep.subr.bf16.mxu0 %v1975_v0  ;;  %1476 = vmatprep.mubr.msk.bf16.mxu0 %vm1976_vm0, %v1975_v0  ;;  %vm656_vm1 = vcmask 261120   ;;  %v1647_v4 = vld [vmem:[#allocation10] sm:$0xff]   ;;  %v1648_v5 = vld [vmem:[#allocation10 + $0x8] sm:$0xff]   ;;  %vm767_vm2 = vcmask 257024  }
  0xd9   : > { %1480 = vmatprep.subr.bf16.mxu1 %v1975_v0  ;;  %1484 = vmatprep.mubr.msk.bf16.mxu1 %vm1976_vm0, %v1975_v0  ;;  %v2374_v6 = vld [vmem:[%s536_s10] sm:$0xff]  ;;  %v1649_v8 = vld [vmem:[#allocation12] sm:$0xff]   ;;  %v1650_v9 = vld [vmem:[#allocation12 + $0x8] sm:$0xff]   ;;  %s2616_s15 = sld [smem:[#allocation34_spill]]  ;;  %vm844_vm3 = vcmask 130048   ;;  %s1977_s9 = smov 112  }
  0xda   : > { %1473 = vmatpush3.bf16.msra.mxu0 %v1645_v1  ;;  %v772_v7 = vpack.c.bf16 %v2374_v6, %v2374_v6  ;;  %1481 = vmatpush3.bf16.msra.mxu1 %v1649_v8  ;;  %v632_v10 = vld [vmem:[%s2345_s18] sm:$0xf]  ;;  %v1425_v29 = vld [vmem:[#allocation13] ss:$0 sm:$0xff]  ;;  %vm909_vm4 = vcmask 1043456   ;;  %vm891_vm5 = vcmask 64512  }
  0xdb   : > { %1474 = vmatprep.subr.bf16.mxu0 %v1975_v0  ;;  %1482 = vmatprep.subr.bf16.mxu1 %v1975_v0  ;;  %v1421_v11 = vld [vmem:[%s2541_s6] ss:$0 sm:$0xff]  ;;  %vm904_vm6 = vcmask 60416   ;;  %s2418_s16 = scalar_lea.vmem [#allocation16], %s2331_s24  ;;  %s2617_s20 = sld [smem:[#allocation35_spill]] }
  0xdc   : > { %s1978_s23 = smov 16   ;;  %s2618_s22 = sld [smem:[#allocation36_spill]] }
  0xdd   : > { %s2619_s18 = sld [smem:[#allocation26_spill]]  ;;  %s2620_s21 = sld [smem:[#allocation30_spill]] }
  0xde   : > { %1475 = vmatpush3.bf16.msra.mxu0 %v1646_v2  ;;  %1483 = vmatpush3.bf16.msra.mxu1 %v1650_v9  ;;  %s1211_s19 = sshll.u32 %s2418_s16, 4  ;;  %s2621_s13 = sld [smem:[#allocation40_spill]]  ;;  %s2448_s19 = int_to_ptr.vmem [resolvable:$true] %s1211_s19 }
  0xdf   : > { %1488 = vmatprep.subr.bf16.mxu0 %v1975_v0  ;;  %1496 = vmatprep.subr.bf16.mxu1 %v1975_v0  ;;  %v1429_v18 = vld [vmem:[%s2616_s15] ss:$0 sm:$0xff]  ;;  %s1184_s4 = scalar_lea.sflag [#allocation17], %s2328_s3  ;;  %s1839_s15 = scalar_lea.vmem %s2448_s19, 128 }
  0xe0   : > { %p1840_p10 = scmp.ne.s32.totalorder %s2448_s19, %s1839_s15 }
  0xe1   : > { %1477 = vmatmul.mubr.msk.bf16.vlgmr.msra.gmra.mrb[0].mxu0 %vm656_vm1, %v631_v3  ;;  %1485 = vmatmul.mubr.msk.bf16.vlgmr.msra.gmra.mrb[0].mxu1 %vm656_vm1, %v632_v10  ;;  %v1653_v10 = vld [vmem:[%s2617_s20] sm:$0xff]  }
  0xe2   : > { %1489 = vmatpush3.bf16.msra.mxu0 %v1647_v4  ;;  %1492 = vmatprep.mubr.msk.bf16.mxu0 %vm1976_vm0, %v1975_v0 }
  0xe3   : > { %1490 = vmatprep.subr.bf16.mxu0 %v1975_v0  ;;  %1498 = vmatprep.mubr.msk.bf16.mxu1 %vm1976_vm0, %v1975_v0  ;;  %s1449_s12 = sshll.u32 %s2619_s18, 6  ;;  %p2622_p13 = scmp.ne.s32.totalorder %s2620_s21, 0 }
  0xe4   : > { %s2446_s1 = scalar_lea.hbm %s2621_s13, %s1449_s12 }
  0xe5   : > { %p1841_p11 = pnand %p1840_p10, %p2622_p13 }
  0xe6   : > { %1491 = vmatpush3.bf16.msra.mxu0 %v1648_v5 }
  0xe7   : > { %1502 = vmatprep.subr.bf16.mxu0 %v1975_v0  ;;  %p1842_p1 = pneg %p1841_p11 }
  0xe9   : > { %1493 = vmatmul.mubr.msk.bf16.vlgmr.msra.gmra.mrb[4].mxu0 %vm656_vm1, %v772_v7 }
  0xea   : > { %1504 = vmatprep.mubr.msk.bf16.mxu0 %vm1976_vm0, %v1975_v0 }
 0x1b4   : > { %v694_v12 = vpop.f32.mrb[0].mxu0  ;;  %v760_v30 = vpop.f32.mrb[0].mxu1 }
 0x1b5   : > { %v695_v13 = vadd.f32 %v1421_v11, %v694_v12  ;;  %v1478_v14 = vpop.f32.mrb[1].mxu0  ;;  %v761_v31 = vadd.f32 %v1425_v29, %v760_v30  ;;  %v1486_v32 = vpop.f32.mrb[1].mxu1 }
 0x1b6   : > { %v697_v15 = vpop.f32.mrb[2].mxu0  ;;  %v763_v33 = vpop.f32.mrb[2].mxu1 }
 0x1b7   : > { %v766_v16 = vpack.c.bf16 %v695_v13, %v695_v13  ;;  %v1479_v17 = vpop.f32.mrb[3].mxu0  ;;  %v769_v34 = vpack.c.bf16 %v761_v31, %v761_v31  ;;  %v1487_v35 = vpop.f32.mrb[3].mxu1  ;;  %v1654_v15 = vld [vmem:[%s2617_s20 + $0x8] sm:$0xff]  }
 0x1b9   : > { %768 = vst.msk [vmem:[#allocation2] sm:$0xf] %vm767_vm2, %v766_v16  ;;  %770 = vst.msk [vmem:[#allocation3] sm:$0xf] %vm767_vm2, %v769_v34 }
 0x1bc   : > { %v834_v19 = vpop.f32.mrb[4].mxu0 }
 0x1bd   : > { %v835_v20 = vadd.f32 %v1429_v18, %v834_v19  ;;  %v1494_v21 = vpop.f32.mrb[5].mxu0 }
 0x1be   : > { %v837_v22 = vpop.f32.mrb[6].mxu0 }
 0x1bf   : > { %v840_v23 = vmul.f32 0.25, %v835_v20  ;;  %v1495_v24 = vpop.f32.mrb[7].mxu0 }
 0x1c0   : > { %v842_v25 = vld [vmem:[#allocation2] sm:$0xf]  ;;  %v843_v36 = vld [vmem:[#allocation3] sm:$0xf] }
 0x1c1   : > { %v1651_v26 = vld [vmem:[#allocation2] ss:$0 sps:$4 sm:$0xff]   ;;  %v849_v27 = vsel %vm844_vm3, %v842_v25, 0  ;;  %v841_v28 = vpack.c.bf16 %v840_v23, %v840_v23  ;;  %v911_v37 = vsel %vm909_vm4, %v843_v36, 0  ;;  %v1652_v61 = vld [vmem:[#allocation3] ss:$0 sps:$4 sm:$0xff]  }
 0x1c2   : > { %1497 = vmatpush3.bf16.xpose.msra.mxu1 %v849_v27  ;;  %961 = vrot.lane.b32.xlu0 %v1651_v26, %s1977_s9 }
 0x1c3   : > { %1508 = vmatprep.subr.bf16.mxu1 %v1975_v0  ;;  %1503 = vmatpush3.bf16.msra.mxu0 %v911_v37 }
 0x1c4   : > { %1514 = vmatprep.subr.bf16.mxu0 %v1975_v0 }
 0x1c6   : > { %956 = vrot.lane.b32.xlu0 %v841_v28, %s1977_s9 }
 0x1c9   : > { %1499 = vmatmul.mubr.msk.bf16.vlgmr.msra.gmra.mrb[4].mxu1 %vm844_vm3, %v841_v28 }
 0x1ca   : > { %1510 = vmatprep.mubr.msk.bf16.mxu1 %vm1976_vm0, %v1975_v0 }
 0x234   : > { %v962_v38 = vpop.permute.xlu0 %961 }
 0x235   : > { %v967_v39 = vsel %vm844_vm3, %v962_v38, 0 }
 0x236   : > { %1509 = vmatpush3.bf16.xpose.msra.mxu1 %v967_v39 }
 0x237   : > { %1520 = vmatprep.subr.bf16.mxu1 %v1975_v0 }
 0x238   : > { %v957_v40 = vpop.permute.xlu0 %956 }
 0x23d   : > { %1511 = vmatmul.mubr.msk.bf16.vlgmr.msra.gmra.mrb[8].mxu1 %vm844_vm3, %v957_v40 }
 0x23e   : > { %1524 = vmatprep.mubr.msk.bf16.mxu1 %vm1976_vm0, %v1975_v0  ;;  %1521 = vmatpush3.bf16.msra.mxu1 %v1653_v10 }
 0x23f   : > { %1522 = vmatprep.subr.bf16.mxu1 %v1975_v0 }
 0x242   : > { %1523 = vmatpush3.bf16.msra.mxu1 %v1654_v15 }
 0x29c   : > { %v885_v41 = vpop.f32.mrb[4].mxu1 }
 0x29d   : > { %v1500_v42 = vpop.f32.mrb[5].mxu1  ;;  %v892_v43 = vsel %vm891_vm5, %v885_v41, -inf }
 0x29e   : > { %893 = vmax.xlane.f32.xlu1 %v892_v43  ;;  %v888_v44 = vpop.f32.mrb[6].mxu1 }
 0x29f   : > { %v1501_v45 = vpop.f32.mrb[7].mxu1 }
 0x310   : > { %v1003_v46 = vpop.f32.mrb[8].mxu1 }
 0x311   : > { %v1512_v47 = vpop.f32.mrb[9].mxu1  ;;  %v1009_v48 = vsel %vm891_vm5, %v1003_v46, -inf }
 0x312   : > { %1010 = vmax.xlane.f32.xlu1 %v1009_v48  ;;  %v1006_v49 = vpop.f32.mrb[10].mxu1 }
 0x313   : > { %v1513_v50 = vpop.f32.mrb[11].mxu1 }
 0x32b   : > { %v894_v51 = vpop.xlane.xlu1 %893 }
 0x32c   : > { %v895_v52 = vsub.f32 %v885_v41, %v894_v51 }
 0x32e   : > { %v896_v53 = vmul.f32 1.442695, %v895_v52 }
 0x330   : > { %1655 = vpow2.f32 %v896_v53 }
 0x33a   : > { %v1656_v54 = vpop.eup %1655 }
 0x33b   : > { %v898_v55 = vsel %vm891_vm5, %v1656_v54, 0.0 }
 0x33c   : > { %899 = vadd.xlane.f32.xlu0 %v898_v55 }
 0x39f   : > { %v1011_v56 = vpop.xlane.xlu1 %1010 }
 0x3a0   : > { %v1012_v57 = vsub.f32 %v1003_v46, %v1011_v56 }
 0x3a2   : > { %v1013_v58 = vmul.f32 1.442695, %v1012_v57 }
 0x3a4   : > { %1657 = vpow2.f32 %v1013_v58 }
 0x3ae   : > { %v1658_v59 = vpop.eup %1657 }
 0x3af   : > { %v1015_v60 = vsel %vm891_vm5, %v1658_v59, 0.0 }
 0x3b0   : > { %1016 = vadd.xlane.f32.xlu1 %v1015_v60 }
 0x3c1   : > { %1026 = vrot.lane.b32.xlu1 %v1652_v61, %s1977_s9  ;;  %s1979_s9 = smov [#allocation16]  }
 0x3c2   : > { %s1843_s11 = sshll.u32 %s1979_s9, 4  ;;  %s1844_s11 = int_to_ptr.vmem [resolvable:$false] %s1843_s11 }
 0x3c3   : > { %p1846_p6 = scmp.lt.s32.totalorder %s2448_s19, %s1844_s11 }
 0x3c9   : > { %v900_v62 = vpop.xlane.xlu0 %899 }
 0x3ca   : > { %1659 = vrcp.f32 %v900_v62 }
 0x3d4   : > { %v1660_v63 = vpop.eup %1659 }
 0x3d5   : > { %v902_v1 = vmul.f32 %v1660_v63, %v1656_v54 }
 0x3d7   : > { %v903_v2 = vpack.c.bf16 %v902_v1, %v902_v1 }
 0x3d9   : > { %1505 = vmatmul.mubr.msk.bf16.vlgmr.msra.gmra.mrb[8].mxu0 %vm891_vm5, %v903_v2  ;;  %905 = vst.msk [vmem:[%s2418_s16] sm:$0xf] %vm904_vm6, %v903_v2 }
 0x3da   : > { %1516 = vmatprep.mubr.msk.bf16.mxu0 %vm1976_vm0, %v1975_v0  ;;  %v1440_v0 = vld [vmem:[%s2618_s22] ss:$0 sm:$0xff] }
 0x43d   : > { %v1017_v3 = vpop.xlane.xlu1 %1016 }
 0x43e   : > { %1661 = vrcp.f32 %v1017_v3 }
 0x441   : > { %v1027_v4 = vpop.permute.xlu1 %1026 }
 0x442   : > { %v1032_v5 = vsel %vm909_vm4, %v1027_v4, 0 }
 0x443   : > { %1515 = vmatpush3.bf16.msra.mxu0 %v1032_v5 }
 0x448   : > { %v1662_v7 = vpop.eup %1661 }
 0x449   : > { %v1019_v8 = vmul.f32 %v1662_v7, %v1658_v59 }
 0x44b   : > { %v1020_v9 = vpack.c.bf16 %v1019_v8, %v1019_v8 }
 0x44d   : > { %1517 = vmatmul.mubr.msk.bf16.vlgmr.msra.gmra.mrb[12].mxu0 %vm891_vm5, %v1020_v9  ;;  %1437 = vst.msk [vmem:[%s2418_s16 + $0x4] sm:$0xf] %vm904_vm6, %v1020_v9  ;;  %s1845_s16 = scalar_lea.vmem %s1844_s11, 256 }
 0x44e   : > { %p1847_p8 = scmp.lt.s32.totalorder %s1845_s16, %s1839_s15 }
 0x450   : > { %p1848_p0 = por %p1847_p8, %p1846_p6 }
 0x452   : > { %p1849_p5 = pnand %p1848_p0, %p1842_p1 }
 0x4ac   : > { %v947_v11 = vpop.f32.mrb[8].mxu0 }
 0x4ad   : > { %v1506_v12 = vpop.f32.mrb[9].mxu0 }
 0x4ae   : > { %v950_v13 = vpop.f32.mrb[10].mxu0 }
 0x4af   : > { %v1507_v14 = vpop.f32.mrb[11].mxu0 }
 0x520   : > { %v1068_v16 = vpop.f32.mrb[12].mxu0 }
 0x521   : > { %1075 = vrot.lane.b32.xlu1 %v1068_v16, %s1978_s23  ;;  %v1518_v17 = vpop.f32.mrb[13].mxu0 }
 0x522   : > { %v1071_v18 = vpop.f32.mrb[14].mxu0 }
 0x523   : > { %v1519_v19 = vpop.f32.mrb[15].mxu0 }
 0x593   : > { %v1076_v20 = vpop.permute.xlu1 %1075 }
 0x594   : > { %v1078_v21 = vsel %vm844_vm3, %v947_v11, %v1076_v20 }
 0x595   : > { %v1079_v22 = vpack.c.bf16 %v1078_v21, %v1078_v21 }
 0x597   : > { %1525 = vmatmul.mubr.msk.bf16.vlgmr.msra.gmra.mrb[12].mxu1 %vm656_vm1, %v1079_v22 }
 0x66a   : > { %v1140_v23 = vpop.f32.mrb[12].mxu1 }
 0x66b   : > { %v1141_v24 = vadd.f32 %v1440_v0, %v1140_v23  ;;  %v1526_v25 = vpop.f32.mrb[13].mxu1 }
 0x66c   : > { %v1143_v26 = vpop.f32.mrb[14].mxu1 }
 0x66d   : > { %v1527_v27 = vpop.f32.mrb[15].mxu1  ;;  %v1146_v28 = vadd.f32 %v1141_v24, %v2374_v6 }
 0x66f   : > { %v1147_v29 = vsel %vm656_vm1, %v1146_v28, 0.0 }
 0x670   : > { %1148 = vadd.xlane.f32.xlu1 %v1147_v29 }
 0x6fd   : > { %v1149_v30 = vpop.xlane.xlu1 %1148 }
 0x6fe   : > { %v1151_v31 = vmul.f32 0.03125, %v1149_v30 }
 0x700   : > { %v1152_v32 = vsub.f32 %v1146_v28, %v1151_v31 }
 0x702   : > { %v1153_v33 = vmul.f32 %v1152_v32, %v1152_v32 }
 0x704   : > { %v1154_v34 = vsel %vm656_vm1, %v1153_v33, 0.0 }
 0x705   : > { %1155 = vadd.xlane.f32.xlu0 %v1154_v34 }
 0x706   : > { %1852 = shalt.err (!%p1849_p5)
}
 0x707   : > { %s1853_s27 = scalar_lea.hbm %s2446_s1, 128  ;;  %s1857_s23 = scalar_lea.hbm %s2621_s13, 256 }
 0x708   : > { %p1854_p12 = scmp.ne.s32.totalorder %s2446_s1, %s1853_s27  ;;  %p1858_p9 = scmp.lt.u32.totalorder %s2446_s1, %s2621_s13 }
 0x709   : > { %p1859_p2 = scmp.lt.u32.totalorder %s1857_s23, %s1853_s27  ;;  %p1861_p10 = scmp.lt.u32.totalorder %s1853_s27, %s2446_s1 }
 0x70a   : > { %p1855_p7 = pnand %p1854_p12, %p2622_p13 }
 0x70b   : > { %p1860_p4 = por %p1859_p2, %p1858_p9 }
 0x70c   : > { %p1856_p3 = pneg %p1855_p7 }
 0x70d   : > { %p1862_p11 = por %p1861_p10, %p1860_p4 }
 0x70f   : > { %p1863_p1 = pnand %p1862_p11, %p1856_p3 }
 0x711   : > { %1866 = shalt.err (!%p1863_p1)
}
 0x712   : > { %s1980_s22 = smov 64   ;;  %s1981_s12 = smov 128  }
 0x713   : > { %s1982_s26 = smov 4   ;;  %s2623_s9 = sld [smem:[#allocation37_spill]] }
 0x714   : > { %1547 = dma.vmem_to_hbm [thread:$0]  (%p2622_p13), %s2448_s19, 128, %s2446_s1, %s1184_s4, %s1980_s22, %s1981_s12, %s1982_s26  }
 0x715   : > { %s2624_s27 = sld [smem:[#allocation38_spill]]  ;;  %s1448_s14 = sshll.u32 %s2619_s18, 7 }
 0x716   : > { %s618_s10 = scalar_lea.vmem [#allocation15], %s2331_s24  ;;  %s2625_s4 = sld [smem:[#allocation39_spill]] }
 0x717   : > { %s1198_s23 = sshll.u32 %s618_s10, 4  ;;  %s1179_s29 = scalar_lea.sflag [#allocation6], %s2328_s3  ;;  %s2487_s23 = int_to_ptr.vmem [resolvable:$true] %s1198_s23 }
 0x718   : > { %s1867_s22 = scalar_lea.vmem %s2487_s23, 128  ;;  %s1983_s24 = smov [#allocation15]  }
 0x719   : > { %v1444_v38 = vld [vmem:[%s2623_s9] ss:$0 sm:$0xff]  ;;  %p1868_p6 = scmp.ne.s32.totalorder %s2487_s23, %s1867_s22  ;;  %s1871_s18 = sshll.u32 %s1983_s24, 4  ;;  %s1872_s18 = int_to_ptr.vmem [resolvable:$false] %s1871_s18 }
 0x71a   : > { %s1873_s12 = scalar_lea.vmem %s1872_s18, 256  ;;  %p1874_p5 = scmp.lt.s32.totalorder %s2487_s23, %s1872_s18 }
 0x71b   : > { %v1445_v40 = vld [vmem:[%s2624_s27] ss:$0 sm:$0xff]  ;;  %p1869_p8 = pnand %p1868_p6, %p2622_p13  ;;  %p1875_p12 = scmp.lt.s32.totalorder %s1873_s12, %s1867_s22 }
 0x71c   : > { %s2485_s25 = scalar_lea.hbm %s2625_s4, %s1448_s14 }
 0x71d   : > { %p1870_p0 = pneg %p1869_p8  ;;  %p1876_p7 = por %p1875_p12, %p1874_p5 }
 0x71f   : > { %p1877_p3 = pnand %p1876_p7, %p1870_p0 }
 0x792   : > { %v1156_v6 = vpop.xlane.xlu0 %1155 }
 0x793   : > { %v1157_v35 = vmul.f32 0.03125, %v1156_v6 }
 0x795   : > { %v1158_v36 = vadd.f32 1e-05, %v1157_v35 }
 0x797   : > { %1663 = vrsqrt.f32 %v1158_v36 }
 0x7a1   : > { %v1664_v37 = vpop.eup %1663 }
 0x7a2   : > { %v1160_v39 = vmul.f32 %v1664_v37, %v1152_v32 }
 0x7a4   : > { %v1168_v41 = vmul.f32 %v1444_v38, %v1160_v39 }
 0x7a6   : > { %v1176_v42 = vadd.f32 %v1445_v40, %v1168_v41 }
 0x7a8   : > { %1177 = vst.msk [vmem:[%s618_s10] sm:$0xff] %vm656_vm1, %v1176_v42 }
 0x7a9   : > { %1880 = shalt.err (!%p1877_p3)
}
 0x7aa   : > { %s1881_s3 = scalar_lea.hbm %s2485_s25, 128  ;;  %s1885_s15 = scalar_lea.hbm %s2625_s4, 256 }
 0x7ab   : > { %p1882_p9 = scmp.ne.s32.totalorder %s2485_s25, %s1881_s3  ;;  %p1886_p10 = scmp.lt.u32.totalorder %s2485_s25, %s2625_s4 }
 0x7ac   : > { %p1887_p11 = scmp.lt.u32.totalorder %s1885_s15, %s1881_s3  ;;  %p1889_p6 = scmp.lt.u32.totalorder %s1881_s3, %s2485_s25 }
 0x7ad   : > { %p1883_p2 = pnand %p1882_p9, %p2622_p13 }
 0x7ae   : > { %p1888_p1 = por %p1887_p11, %p1886_p10 }
 0x7af   : > { %p1884_p4 = pneg %p1883_p2 }
 0x7b0   : > { %p1890_p8 = por %p1889_p6, %p1888_p1 }
 0x7b2   : > { %p1891_p0 = pnand %p1890_p8, %p1884_p4 }
 0x7b4   : > { %1894 = shalt.err (!%p1891_p0)
}
 0x7b5   : > { %1546 = dma.vmem_to_hbm [thread:$0]  (%p2622_p13), %s2487_s23, 128, %s2485_s25, %s1179_s29  }
 0x7b6 PF: > { %s2626_s16 = sld [smem:[#allocation24_spill]]  ;;  %s2627_s27 = sld [smem:[#allocation28_spill]] }
 0x7b7   : > { %s2628_s14 = sld [smem:[#allocation27_spill]] }
 0x7bc   : > { %s1226_s10 = sand.u32 1, %s2626_s16   ;;  %p2629_p5 = scmp.ne.s32.totalorder %s2627_s27, 0 }
 0x7bd   : > { %p2630_p12 = scmp.ge.s32.totalorder %s2628_s14, 2  ;;  %s1227_s19 = scalar_lea.sflag [#allocation6], %s1226_s10 }
 0x7bf   : > { %p1571_p7 = pnand %p2630_p12, %p2629_p5 }
 0x7c1   : > { %1936 = dma.done.wait (!%p1571_p7), %s1227_s19, 128  }
 0x7c2   : > { %1938 = vsyncadd (!%p1571_p7), %s1227_s19, 4294967168  ;;  %s1236_s1 = scalar_lea.sflag [#allocation17], %s1226_s10 }
 0x7c3   : > { %1940 = dma.done.wait (!%p1571_p7), %s1236_s1, 128  }
 0x7c4   : > { %1942 = vsyncadd (!%p1571_p7), %s1236_s1, 4294967168  ;;  %s39_s18 = sadd.s32 1, %s2628_s14   ;;  %s2631_s21 = sld [smem:[#allocation25_spill]] }
 0x7c5   : > { %p36_p3 = scmp.ge.s32.totalorder %s39_s18, 4   ;;  %s2632_s15 = sld [smem:[#allocation31_spill]] }
 0x7c6   : > { %s2633_s23 = sld [smem:[#allocation29_spill]]  ;;  %s2634_s29 = smov %s1949_s30 }
 0x7c7   : > { %s2636_s16 = smov %s1961_s17  ;;  %38 = sbr.rel (!%p36_p3) target bundleno = 22 (0x16), region = 175 }
 0x7ca   : > { %s2635_s30 = smov %s2631_s21 }
 0x7cc   : > { %s2637_s17 = smov %s2633_s23 }
 0x7ce   :  { %1241 = vsyncpa [#allocation5], 1 }
 0x7cf   :  { %1243 = vsyncpa [#allocation5 + $0x1], 1 }
 0x7d0   :  { %1244 = vsyncpa [#allocation8], 1 }
 0x7d1   :  { %1246 = vsyncpa [#allocation8 + $0x1], 1 }
 0x7d2   :  { %1247 = vsyncpa [#allocation11], 1 }
 0x7d3   :  { %1248 = vsyncpa [#allocation14], 1 }
 0x7d4   :  { %1249 = vsyncpa [#allocation6], 1 }
 0x7d5   :  { %1251 = vsyncpa [#allocation6 + $0x1], 1 }
 0x7d6   :  { %1252 = vsyncpa [#allocation17], 1 }
 0x7d7   :  { %1254 = vsyncpa [#allocation17 + $0x1], 1 }

</bundles_post_ra>
